<compile_context>
chip_gen: v5e
topology: v5e:2x2
jax: 0.10.0
libtpu: 0.0.40
codegen_flags: <defaults>
</compile_context>

<pallas_src>
import jax
import jax.numpy as jnp
from jax.experimental import pallas as pl
from jax.experimental.pallas import tpu as pltpu


def _noise_injection_kernel(w_ref, img_ref, noise_ref, out_ref):
    # w_ref: (1,) scalar parameter in SMEM.
    # img_ref/out_ref: (TB, TC, TL) VMEM tiles; noise_ref: (TB, 1, TL) tile.
    # jnp broadcasting over the channel axis handles the C-broadcast on the VPU.
    w = w_ref[0]
    out_ref[...] = img_ref[...] + w * noise_ref[...]


def _vmem_budget():
    """(per-image-tile byte budget, optional scoped-VMEM override) per TPU gen.

    Double-buffered working set per step ~= 2x image-in + 2x out + 2x noise,
    i.e. a bit over 4x the image tile:
      v5e : 16 MiB default scoped limit   -> ~3 MiB tile, no override
      v6e : 128 MiB physical VMEM         -> ~6 MiB tile, raise scoped to 48 MiB
      v7x : 64 MiB physical (32 scoped)   -> ~4 MiB tile, stay under the default
    """
    try:
        kind = jax.devices()[0].device_kind.lower()
    except Exception:
        kind = ""
    if "v6" in kind:
        return 6 * 1024 * 1024, 48 * 1024 * 1024
    if "v7" in kind:
        return 4 * 1024 * 1024, None
    # v5e / unknown: conservative.
    return 3 * 1024 * 1024, None


def _divisors_desc(n):
    return [d for d in range(n, 0, -1) if n % d == 0]


def _pick_tiles(B, C, L, itemsize, max_tile_bytes):
    """Choose (TB, TC, TL).

    TL: multiple of 128 dividing L (full extent L as fallback for odd L).
    TC: full C when it fits the budget at TL >= 128; otherwise the largest
        sublane-aligned divisor of C that fits (block stays layout-legal).
    TB: > 1 only when one tile already covers a whole (C, L) image, to cut
        grid-step count on tiny problems (keeps >= 2 steps when B >= 2).
    TL is co-optimized with TC: largest legal TL with TC*TL*itemsize <= budget.
    """
    # Sublane packing: f32 -> 8 rows/vreg, bf16 -> 16, int8/fp8 -> 32.
    sub = 8 * max(1, 4 // itemsize)

    tl_cands = [t for t in range(128, L + 1, 128) if L % t == 0]
    if not tl_cands:
        # L is not a multiple of 128 (or < 128): full-extent lane block.
        # Correct, but stores are masked; acceptable for these small/odd shapes.
        tl_cands = [L]
    tl_cands.sort(reverse=True)
    tl_min = tl_cands[-1]

    def best_tl(tc):
        for t in tl_cands:
            if tc * t * itemsize <= max_tile_bytes:
                return t
        return None

    TC = C
    TL = best_tl(C)
    if TL is None:
        # Even a minimum-width lane row of all C channels blows the budget:
        # shrink TC, preferring sublane-pack multiples, then multiples of 8.
        cands = [d for d in _divisors_desc(C) if d % sub == 0]
        cands += [d for d in _divisors_desc(C) if d % 8 == 0 and d % sub != 0]
        chosen = None
        for d in cands:
            if d * tl_min * itemsize <= max_tile_bytes:
                chosen = d
                break
        if chosen is None:
            # Best effort: smallest legal channel block (or full C).
            chosen = min(cands) if cands else C
        TC = chosen
        TL = best_tl(TC) or tl_min

    # Small-problem path: fold batch into the block when one tile covers a full
    # (C, L) image, but keep >= 2 grid steps when B >= 2 (v7x has 2 TCs).
    TB = 1
    if TC == C and TL == L and B > 1:
        for d in _divisors_desc(B):
            if B // d >= 2 and d * TC * TL * itemsize <= max_tile_bytes:
                TB = d
                break

    return TB, TC, TL


def noise_injection(image, weight, noise=None, *, key=None):
    """JAX/Pallas equivalent of NoiseInjection.forward.

    image : (B, C, H, W)
    weight: scalar parameter, shape (1,) or scalar
    noise : optional (B, 1, H, W). If None, a PRNG `key` is required and noise
            is sampled ~ N(0, 1) (PyTorch draws fresh noise every forward, so
            we refuse to silently reuse a fixed seed).
    """
    B, C, H, W = image.shape
    L = H * W
    itemsize = jnp.dtype(image.dtype).itemsize

    if noise is None:
        if key is None:
            raise ValueError(
                "noise_injection: pass `noise` or a PRNG `key` (the PyTorch "
                "module draws fresh noise each forward)."
            )
        # TODO(synk): fuse noise sampling into the kernel via pltpu.prng_seed +
        # pltpu.stateful_normal seeded per (b, l) block, to avoid writing and
        # re-reading the (B, 1, H, W) noise array through HBM.
        noise = jax.random.normal(key, (B, 1, H, W), dtype=image.dtype)

    weight = jnp.asarray(weight, dtype=image.dtype).reshape((1,))
    noise = noise.astype(image.dtype)

    img_flat = image.reshape(B, C, L)
    noise_flat = noise.reshape(B, 1, L)

    max_tile_bytes, vmem_limit = _vmem_budget()
    TB, TC, TL = _pick_tiles(B, C, L, itemsize, max_tile_bytes)

    # Channel-chunk axis innermost: the (TB, 1, TL) noise block index is then
    # invariant across consecutive steps, so Pallas skips re-fetching it when
    # TC < C.
    grid = (B // TB, L // TL, C // TC)

    extra = {"vmem_limit_bytes": vmem_limit} if vmem_limit else {}
    compiler_params = pltpu.CompilerParams(
        dimension_semantics=("parallel", "parallel", "parallel"), **extra
    )

    out_flat = pl.pallas_call(
        _noise_injection_kernel,
        out_shape=jax.ShapeDtypeStruct((B, C, L), image.dtype),
        grid=grid,
        in_specs=[
            pl.BlockSpec(memory_space=pltpu.MemorySpace.SMEM),       # weight
            pl.BlockSpec((TB, TC, TL), lambda b, l, c: (b, c, l)),   # image
            pl.BlockSpec((TB, 1, TL), lambda b, l, c: (b, 0, l)),    # noise
        ],
        out_specs=pl.BlockSpec((TB, TC, TL), lambda b, l, c: (b, c, l)),
        compiler_params=compiler_params,
    )(weight, img_flat, noise_flat)

    return out_flat.reshape(B, C, H, W)


if __name__ == "__main__":
    key = jax.random.PRNGKey(0)
    k_img, k_noise, k_gen = jax.random.split(key, 3)

    B, C, H, W = 2, 4, 16, 16
    image = jax.random.normal(k_img, (B, C, H, W), dtype=jnp.float32)
    noise = jax.random.normal(k_noise, (B, 1, H, W), dtype=jnp.float32)

    # Parameter init matches nn.Parameter(torch.zeros(1)); also a nonzero value
    # so the channel-broadcast path is actually exercised.
    weight_init = jnp.zeros((1,), dtype=jnp.float32)
    weight_test = jnp.array([0.5], dtype=jnp.float32)

    out0 = jax.block_until_ready(noise_injection(image, weight_init, noise))
    out1 = jax.block_until_ready(noise_injection(image, weight_test, noise))
    ref0 = image + weight_init[0] * noise
    ref1 = image + weight_test[0] * noise
    assert out0.shape == (B, C, H, W) and out0.dtype == image.dtype
    assert jnp.allclose(out0, ref0, atol=1e-6, rtol=1e-6)
    assert jnp.allclose(out1, ref1, atol=1e-6, rtol=1e-6)

    # noise=None path (fresh noise from an explicit key).
    out2 = jax.block_until_ready(noise_injection(image, weight_test, key=k_gen))
    assert out2.shape == (B, C, H, W)

    # Larger lane-tiled shape (L = 64*64 = 4096).
    img2 = jax.random.normal(jax.random.PRNGKey(7), (2, 8, 64, 64), jnp.float32)
    nz2 = jax.random.normal(jax.random.PRNGKey(8), (2, 1, 64, 64), jnp.float32)
    out3 = jax.block_until_ready(noise_injection(img2, weight_test, nz2))
    assert jnp.allclose(out3, img2 + weight_test[0] * nz2, atol=1e-6, rtol=1e-6)

    # Batch-folded small-problem path (B=8 tiny images -> TB > 1, 2 grid steps).
    img3 = jax.random.normal(jax.random.PRNGKey(9), (8, 4, 16, 16), jnp.float32)
    nz3 = jax.random.normal(jax.random.PRNGKey(10), (8, 1, 16, 16), jnp.float32)
    out4 = jax.block_until_ready(noise_injection(img3, weight_test, nz3))
    assert jnp.allclose(out4, img3 + weight_test[0] * nz3, atol=1e-6, rtol=1e-6)

    # Odd spatial size (L = 100, not a multiple of 128 -> full-extent fallback).
    img4 = jax.random.normal(jax.random.PRNGKey(11), (2, 4, 10, 10), jnp.float32)
    nz4 = jax.random.normal(jax.random.PRNGKey(12), (2, 1, 10, 10), jnp.float32)
    out5 = jax.block_until_ready(noise_injection(img4, weight_test, nz4))
    assert jnp.allclose(out5, img4 + weight_test[0] * nz4, atol=1e-6, rtol=1e-6)

    # bf16 path (exercises dtype-aware sublane packing in the tile picker).
    img5 = img2.astype(jnp.bfloat16)
    nz5 = nz2.astype(jnp.bfloat16)
    out6 = jax.block_until_ready(noise_injection(img5, weight_test, nz5))
    ref6 = img5 + jnp.asarray(0.5, jnp.bfloat16) * nz5
    assert jnp.allclose(out6.astype(jnp.float32), ref6.astype(jnp.float32),
                        atol=1e-2, rtol=1e-2)

    print("KERNEL_OK")
</pallas_src>

<mosaic_0001>
module attributes {stable_mosaic.version = 11 : i64} {
  func.func @_noise_injection_kernel(%arg0: i32, %arg1: i32, %arg2: i32, %arg3: memref<1xf32, #tpu.memory_space<smem>>, %arg4: memref<1x4x256xf32, #tpu.memory_space<vmem>>, %arg5: memref<1x1x256xf32, #tpu.memory_space<vmem>>, %arg6: memref<1x4x256xf32, #tpu.memory_space<vmem>>) attributes {dimension_semantics = [#tpu.dimension_semantics<parallel>, #tpu.dimension_semantics<parallel>, #tpu.dimension_semantics<parallel>], iteration_bounds = array<i64: 2, 1, 1>, scalar_prefetch = 0 : i64, scratch_operands = 0 : i64, tpu.core_type = #tpu.core_type<tc>, window_params = [{transform_indices = @transform_0, window_bounds = array<i64: 1>}, {transform_indices = @transform_1, window_bounds = array<i64: 1, 4, 256>}, {transform_indices = @transform_2, window_bounds = array<i64: 1, 1, 256>}, {transform_indices = @transform_3, window_bounds = array<i64: 1, 4, 256>}]} {
    %c0 = arith.constant 0 : index
    %0 = memref.load %arg3[%c0] : memref<1xf32, #tpu.memory_space<smem>>
    %c0_0 = arith.constant 0 : index
    %c0_1 = arith.constant 0 : index
    %c0_2 = arith.constant 0 : index
    %1 = vector.load %arg4[%c0_0, %c0_1, %c0_2] : memref<1x4x256xf32, #tpu.memory_space<vmem>>, vector<1x4x256xf32>
    %c0_3 = arith.constant 0 : index
    %c0_4 = arith.constant 0 : index
    %c0_5 = arith.constant 0 : index
    %2 = vector.load %arg5[%c0_3, %c0_4, %c0_5] : memref<1x1x256xf32, #tpu.memory_space<vmem>>, vector<1x1x256xf32>
    %3 = vector.broadcast %0 : f32 to vector<1x1x256xf32>
    %4 = arith.mulf %3, %2 : vector<1x1x256xf32>
    %5 = vector.broadcast %4 : vector<1x1x256xf32> to vector<1x4x256xf32>
    %6 = arith.addf %1, %5 : vector<1x4x256xf32>
    %c0_6 = arith.constant 0 : index
    %c0_7 = arith.constant 0 : index
    %c0_8 = arith.constant 0 : index
    %7 = vector.load %arg6[%c0_6, %c0_7, %c0_8] : memref<1x4x256xf32, #tpu.memory_space<vmem>>, vector<1x4x256xf32>
    tpu.vector_store %arg6[%c0_6, %c0_7, %c0_8], %6 {strides = array<i32>} : memref<1x4x256xf32, #tpu.memory_space<vmem>>, vector<1x4x256xf32>,
    return
  }
  func.func @transform_0(%arg0: i32, %arg1: i32, %arg2: i32) -> i32 {
    %c0_i32 = arith.constant 0 : i32
    %c0_i32_0 = arith.constant 0 : i32
    return %c0_i32 : i32
  }
  func.func @transform_1(%arg0: i32, %arg1: i32, %arg2: i32) -> (i32, i32, i32) {
    %c0_i32 = arith.constant 0 : i32
    return %arg0, %arg2, %arg1 : i32, i32, i32
  }
  func.func @transform_2(%arg0: i32, %arg1: i32, %arg2: i32) -> (i32, i32, i32) {
    %c0_i32 = arith.constant 0 : i32
    %c0_i32_0 = arith.constant 0 : i32
    return %arg0, %c0_i32, %arg1 : i32, i32, i32
  }
  func.func @transform_3(%arg0: i32, %arg1: i32, %arg2: i32) -> (i32, i32, i32) {
    %c0_i32 = arith.constant 0 : i32
    return %arg0, %arg2, %arg1 : i32, i32, i32
  }
}

</mosaic_0001>

<bundles_post_ra>
// kernel: tpu_custom_call.1
= control target key start
LH: loop header
LB: loop body
LE: loop exit
PB: predicated region body
PF: predicated region fallthrough
CT: control target
= control target key end

     0   :  { %s814_s0 = inlined_call_operand.<no memory space> [shape: f32[1], index: 0, kind: input, shape index: {}]   ;;  %s815_s1 = inlined_call_operand.hbm [shape: f32[2,4,256], index: 1, kind: input, shape index: {}]   ;;  %s816_s2 = inlined_call_operand.hbm [shape: f32[2,1,256], index: 2, kind: input, shape index: {}]   ;;  %s817_s3 = inlined_call_operand.hbm [shape: f32[2,4,256], index: 3, kind: output, shape index: {}]  }
   0x1   :  { %8 = sst [smem:[#allocation2]] %s814_s0 }
   0x2   :  { %9 = vsyncpa [#allocation4], 0 }
   0x3   :  { %11 = vsyncpa [#allocation4 + $0x1], 0 }
   0x4   :  { %12 = vsyncpa [#allocation7], 0 }
   0x5   :  { %14 = vsyncpa [#allocation7 + $0x1], 0 }
   0x6   :  { %15 = vsyncpa [#allocation5], 0 }
   0x7   :  { %17 = vsyncpa [#allocation5 + $0x1], 0  ;;  %s676_s14 = smov 0   ;;  %s678_s15 = smov 0  }
   0x8   :  { %s680_s16 = smov 0   ;;  %s682_s17 = smov 0  }
   0x9   :  { %s684_s18 = smov 0   ;;  %s686_s19 = smov 0  }
   0xa LB: > { %s418_s0 = sadd.s32 4294967295, %s651_s19   ;;  %s419_s20 = sadd.s32 4294967294, %s651_s19   ;;  %s651_s19 = sphi %s686_s19, %s23_s19   ;;  %s647_s18 = sphi %s684_s18, %s827_s18   ;;  %s643_s17 = sphi %s682_s17, %s826_s17   ;;  %s639_s16 = sphi %s680_s16, %s825_s16   ;;  %s635_s15 = sphi %s678_s15, %s824_s15   ;;  %s631_s14 = sphi %s676_s14, %s823_s14  }
   0xb   : > { %s42_s21 = sadd.s32 1, %s647_s18  ;;  %s74_s22 = sadd.s32 1, %s639_s16 }
   0xc   : > { %p44_p0 = scmp.ge.s32.totalorder %s42_s21, 2  ;;  %p81_p1 = scmp.ne.s32.totalorder %s639_s16, %s635_s15 }
   0xd   : > { %p82_p2 = scmp.eq.s32.totalorder %s651_s19, 0  ;;  %p87_p3 = scmp.ne.s32.totalorder %s635_s15, %s631_s14 }
   0xe   : > { %s829_s21 = smov (%p44_p0, %s42_s21), 0  ;;  %p88_p5 = scmp.eq.s32.totalorder %s418_s0, 0 }
   0xf   : > { %p717_p4 = por %p82_p2, %p81_p1  ;;  %s67_s24 = ssub.s32 %s647_s18, %s829_s21 }
  0x10   : > { %p143_p6 = scmp.eq.s32.totalorder %s418_s0, 1  ;;  %p72_p7 = scmp.eq.s32.totalorder %s67_s24, 0 }
  0x11   : > { %p723_p8 = por %p88_p5, %p87_p3  ;;  %p149_p10 = scmp.eq.s32.totalorder %s419_s20, 1 }
  0x12   : > { %p727_p9 = por %p143_p6, %p81_p1  ;;  %p421_p12 = scmp.ge.s32.totalorder %s651_s19, 2 }
  0x13   : > { %s732_s27 = scalar_select %p72_p7, %s639_s16, %s74_s22  }
  0x14   : > { %p734_p11 = por %p149_p10, %p87_p3  ;;  %p455_p13 = scmp.lt.s32.totalorder %s651_s19, 2 }
  0x15   : > { %s172_s29 = sand.u32 1, %s639_s16   ;;  %s436_s4 = sshll.u32 %s647_s18, 3 }
  0x16   : > { %s422_s30 = sshll.u32 %s172_s29, 3  ;;  %s185_s7 = scalar_lea.hbm %s815_s1, %s436_s4 }
  0x17   : > { %s176_s8 = scalar_lea.vmem [#allocation3], %s422_s30  ;;  %s187_s10 = sshll.u32 %s185_s7, 4  ;;  %s188_s10 = int_to_ptr.hbm [resolvable:$true] %s187_s10 }
  0x18   : > { %s189_s9 = sshll.u32 %s176_s8, 4  ;;  %p747_p0 = pnand %p455_p13, %p717_p4  ;;  %s190_s9 = int_to_ptr.vmem [resolvable:$true] %s189_s9 }
  0x19   : > { %p427_p1 = scmp.ge.s32.totalorder %s651_s19, 1  ;;  %p215_p2 = scmp.lt.s32.totalorder %s651_s19, 3 }
  0x1a   : > { %s173_s12 = scalar_lea.sflag [#allocation4], %s172_s29  ;;  %s425_s13 = sshll.u32 %s172_s29, 1 }
  0x1b   : > { %447 = dma.hbm_to_vmem [thread:$0]  (!%p747_p0), %s188_s10, 128, %s190_s9, %s173_s12  }
  0x1c   : > { %p216_p3 = pnand %p427_p1, %p215_p2  ;;  %s426_s0 = sshll.u32 %s647_s18, 1 }
  0x1d   : > { %s206_s24 = scalar_lea.hbm %s816_s2, %s426_s0  ;;  %s200_s30 = scalar_lea.vmem [#allocation6], %s425_s13 }
  0x1e   : > { %s210_s23 = sshll.u32 %s200_s30, 4  ;;  %s208_s4 = sshll.u32 %s206_s24, 4  ;;  %s211_s23 = int_to_ptr.vmem [resolvable:$true] %s210_s23  ;;  %s209_s4 = int_to_ptr.hbm [resolvable:$true] %s208_s4 }
  0x1f   : > { %s197_s5 = scalar_lea.sflag [#allocation7], %s172_s29  ;;  %219 = sbr.rel (%p216_p3) target bundleno = 59 (0x3b), region = 32 }
  0x20   : > { %450 = dma.hbm_to_vmem [thread:$0]  (!%p747_p0), %s209_s4, 32, %s211_s23, %s197_s5  }
  0x21   : > { %s762_s6 = sand.u32 (!%p216_p3), 1, %s635_s15  }
  0x22   : > { %s428_s7 = sshll.u32 (!%p216_p3), %s762_s6, 3  ;;  %s222_s8 = scalar_lea.sflag (!%p216_p3), [#allocation4], %s762_s6 }
  0x23   : > { %s225_s9 = scalar_lea.vmem (!%p216_p3), [#allocation3], %s428_s7 }
  0x24   : > { %618 = dma.done.wait (%p723_p8), %s222_s8, 128  }
  0x25   : > { %620 = vsyncadd (%p723_p8), %s222_s8, 4294967168  ;;  %s429_s29 = sshll.u32 %s762_s6, 1  ;;  %s232_s10 = scalar_lea.sflag [#allocation7], %s762_s6 }
  0x26   : > { %s235_s11 = scalar_lea.vmem [#allocation6], %s429_s29 }
  0x27   : > { %622 = dma.done.wait (%p723_p8), %s232_s10, 32  }
  0x28   : > { %624 = vsyncadd (%p723_p8), %s232_s10, 4294967264  ;;  %s267_s12 = sld [smem:[#allocation2]]  ;;  %s437_s13 = sshll.u32 %s643_s17, 3  ;;  %v269_v0 = vld [vmem:[%s235_s11] sm:$0x3]  ;;  %vm276_vm0 = vcmask 1043456  }
  0x29   : > { %s297_s22 = scalar_lea.hbm %s817_s3, %s437_s13  ;;  %v268_v5 = vld [vmem:[%s225_s9] sm:$0xff]  ;;  %s263_s24 = scalar_lea.vmem [#allocation8], %s428_s7 }
  0x2a   : > { %s299_s25 = sshll.u32 %s263_s24, 4  ;;  %s301_s30 = sshll.u32 %s297_s22, 4  ;;  %s300_s25 = int_to_ptr.vmem [resolvable:$true] %s299_s25  ;;  %s302_s30 = int_to_ptr.hbm [resolvable:$true] %s301_s30 }
  0x2b   : > { %s282_s17 = scalar_lea.sflag [#allocation5], %s762_s6  ;;  %s579_s23 = sshra.s32 %s302_s30, 4  ;;  %s580_s23 = int_to_ptr.hbm [resolvable:$true] %s579_s23 }
  0x2c   : > { %s581_s4 = scalar_lea.hbm %s580_s23, 8  ;;  %s585_s9 = scalar_lea.hbm %s817_s3, 16 }
  0x2d   : > { %p582_p4 = scmp.ne.s32.totalorder %s580_s23, %s581_s4  ;;  %p586_p7 = scmp.lt.s32.totalorder %s580_s23, %s817_s3 }
  0x2e   : > { %v270_v1 = vstv %s267_s12  ;;  %p587_p8 = scmp.lt.s32.totalorder %s585_s9, %s581_s4 }
  0x2f   : > { %v271_v2 = vmul.f32 %v270_v1, %v269_v0  ;;  %p583_p5 = pnand %p582_p4, %p727_p9 }
  0x30   : > { %p588_p10 = por %p587_p8, %p586_p7 }
  0x31   : > { %v273_v3 = vperm.slane %v271_v2, 0  ;;  %v274_v4 = vperm.slane %v271_v2, 1  ;;  %p584_p6 = pneg %p583_p5 }
  0x33   : > { %v275_v6 = vrot.slane %v274_v4, 4  ;;  %p589_p13 = pnand %p588_p10, %p584_p6 }
  0x35   : > { %v277_v7 = vsel %vm276_vm0, %v273_v3, %v275_v6 }
  0x36   : > { %v279_v8 = vadd.f32 %v277_v7, %v268_v5 }
  0x38   : > { %280 = vst [vmem:[%s263_s24] sm:$0xff] %v279_v8 }
  0x39   : > { %592 = shalt.err (!%p589_p13)
}
  0x3a   : > { %442 = dma.vmem_to_hbm [thread:$0]  (%p727_p9), %s300_s25, 128, %s302_s30, %s282_s17  }
  0x3b PF: > { %s313_s6 = sand.u32 1, %s631_s14   ;;  %p452_p0 = pnand %p421_p12, %p734_p11 }
  0x3c   : > { %s314_s10 = scalar_lea.sflag [#allocation5], %s313_s6 }
  0x3d   : > { %p453_p1 = pneg %p452_p0 }
  0x3f   : > { %626 = dma.done.wait (%p453_p1), %s314_s10, 128  }
  0x40   : > { %628 = vsyncadd (%p453_p1), %s314_s10, 4294967168  ;;  %s23_s19 = sadd.s32 1, %s651_s19   ;;  %s823_s14 = smov %s635_s15 }
  0x41   : > { %p20_p2 = scmp.ge.s32.totalorder %s23_s19, 4   ;;  %s824_s15 = smov %s639_s16 }
  0x42   : > { %s825_s16 = smov %s732_s27  ;;  %s826_s17 = smov %s647_s18 }
  0x43   : > { %s827_s18 = smov %s829_s21  ;;  %22 = sbr.rel (!%p20_p2) target bundleno = 10 (0xa), region = 90 }
  0x48   :  { %320 = vsyncpa [#allocation4], 1 }
  0x49   :  { %322 = vsyncpa [#allocation4 + $0x1], 1 }
  0x4a   :  { %323 = vsyncpa [#allocation7], 1 }
  0x4b   :  { %325 = vsyncpa [#allocation7 + $0x1], 1 }
  0x4c   :  { %326 = vsyncpa [#allocation5], 1 }
  0x4d   :  { %328 = vsyncpa [#allocation5 + $0x1], 1 }

</bundles_post_ra>
